<compile_context>
chip_gen: v6e
topology: v6e:2x2x1
jax: 0.10.0
libtpu: 0.0.40
codegen_flags: <defaults>
</compile_context>

<pallas_src>
import functools

import jax
import jax.numpy as jnp
from jax.experimental import pallas as pl
from jax.experimental.pallas import tpu as pltpu


def _ln_reduce_kernel(x_ref, g_ref, b_ref, w_ref, o_ref):
    """Fused LayerNorm(4C) + Linear(4C -> out, no bias) on a (TILE_M, 4C) tile.

    x_ref: (TILE_M, 4C) f32 row tile
    g_ref: (1, 4C)      LayerNorm gamma (f32)
    b_ref: (1, 4C)      LayerNorm beta  (f32)
    w_ref: (4C, out)    reduction weight, bf16, already transposed to y @ W form
    o_ref: (TILE_M, out)
    """
    x = x_ref[...].astype(jnp.float32)                      # (TM, 4C)
    mean = jnp.mean(x, axis=-1, keepdims=True)              # f32 stats
    var = jnp.mean(jnp.square(x - mean), axis=-1, keepdims=True)
    xhat = (x - mean) * jax.lax.rsqrt(var + 1e-5)
    y = xhat * g_ref[...] + b_ref[...]                      # (TM, 4C) f32
    y = y.astype(w_ref.dtype)                               # bf16 MXU operand
    o_ref[...] = jnp.dot(
        y, w_ref[...], preferred_element_type=jnp.float32
    ).astype(o_ref.dtype)


def _ln_reduce(rows, gamma, beta, w_red, *, tile_m=256):
    """rows: (R, 4C) -> (R, out) via a row-tiled Pallas kernel."""
    R, C4 = rows.shape
    out_dim = w_red.shape[1]

    # Row tile: multiple of 8 sublanes, capped at the (rounded-up) row count.
    tile_m = max(8, min(tile_m, ((R + 7) // 8) * 8))
    grid = (pl.cdiv(R, tile_m),)

    g2 = gamma.reshape(1, C4).astype(jnp.float32)
    b2 = beta.reshape(1, C4).astype(jnp.float32)
    w16 = w_red.astype(jnp.bfloat16)          # bf16 weight: halves weight DMA bytes

    itemsize = rows.dtype.itemsize
    cost = pl.CostEstimate(
        flops=int(2 * R * C4 * out_dim + 8 * R * C4),
        transcendentals=int(R),               # one rsqrt per row
        bytes_accessed=int(
            R * C4 * itemsize                 # activations in
            + C4 * out_dim * 2                # bf16 weight
            + R * out_dim * itemsize          # output
            + 2 * C4 * 4                      # gamma + beta
        ),
    )

    return pl.pallas_call(
        _ln_reduce_kernel,
        out_shape=jax.ShapeDtypeStruct((R, out_dim), rows.dtype),
        grid_spec=pltpu.PrefetchScalarGridSpec(
            num_scalar_prefetch=0,
            grid=grid,
            in_specs=[
                pl.BlockSpec((tile_m, C4), lambda i: (i, 0)),
                pl.BlockSpec((1, C4), lambda i: (0, 0)),        # gamma: constant -> fetched once
                pl.BlockSpec((1, C4), lambda i: (0, 0)),        # beta
                pl.BlockSpec((C4, out_dim), lambda i: (0, 0)),  # weight (bf16)
            ],
            out_specs=pl.BlockSpec((tile_m, out_dim), lambda i: (i, 0)),
        ),
        compiler_params=pltpu.CompilerParams(
            dimension_semantics=("parallel",),      # many steps -> v7x dual-TC + pipelining
            vmem_limit_bytes=64 * 1024 * 1024,
        ),
        cost_estimate=cost,
    )(rows, g2, b2, w16)


def patch_merging_forward(x, H, W, gamma, beta, w_red, det_token_num, *, tile_m=256):
    """Replicates PatchMerging.forward.

    x: (B, H*W + det_token_num, C) ->
       (B, ceil(H/2)*ceil(W/2) + det_token_num, out_dim).
    """
    B, L, C = x.shape
    assert L == H * W + det_token_num, "input feature has wrong size"

    patch, det = x[:, : H * W, :], x[:, H * W :, :]
    patch = patch.reshape(B, H, W, C)
    if (H % 2 == 1) or (W % 2 == 1):
        patch = jnp.pad(patch, ((0, 0), (0, H % 2), (0, W % 2), (0, 0)))

    x0 = patch[:, 0::2, 0::2, :]
    x1 = patch[:, 1::2, 0::2, :]
    x2 = patch[:, 0::2, 1::2, :]
    x3 = patch[:, 1::2, 1::2, :]
    merged = jnp.concatenate([x0, x1, x2, x3], axis=-1).reshape(B, -1, 4 * C)

    det4 = jnp.tile(det, (1, 1, 4))                       # det.repeat(1, 1, 4)
    tokens = jnp.concatenate([merged, det4], axis=1)      # (B, N, 4C)
    # TODO(synk): read x directly inside the kernel (in-kernel de-interleave or
    # strided DMA) to avoid materializing `tokens` in HBM.

    _, N, C4 = tokens.shape
    rows = tokens.reshape(B * N, C4)                      # free reshape (contiguous)
    out_rows = _ln_reduce(rows, gamma, beta, w_red, tile_m=tile_m)
    return out_rows.reshape(B, N, w_red.shape[1])


def _reference(x, H, W, gamma, beta, w_red, det_token_num, matmul_dtype=jnp.float32):
    """Pure-JAX reference (matmul_dtype selects f32 or bf16-matched matmul)."""
    B, L, C = x.shape
    patch, det = x[:, : H * W, :], x[:, H * W :, :]
    patch = patch.reshape(B, H, W, C)
    if (H % 2 == 1) or (W % 2 == 1):
        patch = jnp.pad(patch, ((0, 0), (0, H % 2), (0, W % 2), (0, 0)))
    x0 = patch[:, 0::2, 0::2, :]
    x1 = patch[:, 1::2, 0::2, :]
    x2 = patch[:, 0::2, 1::2, :]
    x3 = patch[:, 1::2, 1::2, :]
    merged = jnp.concatenate([x0, x1, x2, x3], axis=-1).reshape(B, -1, 4 * C)
    tokens = jnp.concatenate([merged, jnp.tile(det, (1, 1, 4))], axis=1)
    mean = jnp.mean(tokens, axis=-1, keepdims=True)
    var = jnp.mean(jnp.square(tokens - mean), axis=-1, keepdims=True)
    y = (tokens - mean) * jax.lax.rsqrt(var + 1e-5) * gamma + beta
    return jnp.dot(
        y.astype(matmul_dtype), w_red.astype(matmul_dtype),
        preferred_element_type=jnp.float32,
    )


if __name__ == "__main__":
    # Small, module-consistent shapes: dim=32, H=W=32, det_token_num=100, batch=2.
    # -> 712 token rows, grid of 3 TILE_M=256 row tiles (last one ragged).
    dim = 32
    H = W = 32
    det_token_num = 100
    B = 2
    expand_dim = 2 * dim                  # expand=True branch

    key = jax.random.PRNGKey(0)
    kx, kg, kb, kw = jax.random.split(key, 4)

    x = jax.random.normal(kx, (B, H * W + det_token_num, dim), dtype=jnp.float32)

    # Synthetic parameters (shapes from __init__):
    #   norm = LayerNorm(4*dim): gamma/beta (4*dim,)
    #   reduction = Linear(4*dim, 2*dim, bias=False): torch weight is (2*dim, 4*dim);
    #   we store its transpose (4*dim, 2*dim) so the kernel computes y @ W.
    gamma = 1.0 + 0.02 * jax.random.normal(kg, (4 * dim,), dtype=jnp.float32)
    beta = 0.02 * jax.random.normal(kb, (4 * dim,), dtype=jnp.float32)
    w_red = jax.random.normal(kw, (4 * dim, expand_dim), dtype=jnp.float32) * (
        1.0 / jnp.sqrt(4.0 * dim)
    )

    fwd = jax.jit(patch_merging_forward, static_argnums=(1, 2, 6))
    out = fwd(x, H, W, gamma, beta, w_red, det_token_num)
    out = jax.block_until_ready(out)

    N = (H // 2) * (W // 2) + det_token_num
    assert out.shape == (B, N, expand_dim)

    # Tight check vs a reference that uses the same bf16 matmul operands.
    ref_bf16 = _reference(x, H, W, gamma, beta, w_red, det_token_num,
                          matmul_dtype=jnp.bfloat16)
    assert jnp.allclose(out, ref_bf16, atol=5e-3, rtol=5e-3), \
        "mismatch vs bf16-matched reference"

    # Loose check vs the original full-f32 module semantics.
    ref_f32 = _reference(x, H, W, gamma, beta, w_red, det_token_num,
                         matmul_dtype=jnp.float32)
    assert jnp.allclose(out, ref_f32, atol=5e-2, rtol=5e-2), \
        "mismatch vs f32 reference"

    print("KERNEL_OK")
</pallas_src>

<mosaic_0001>
module attributes {stable_mosaic.version = 11 : i64} {
  func.func @_ln_reduce_kernel(%arg0: i32, %arg1: memref<256x128xf32, #tpu.memory_space<vmem>>, %arg2: memref<1x128xf32, #tpu.memory_space<vmem>>, %arg3: memref<1x128xf32, #tpu.memory_space<vmem>>, %arg4: memref<128x64xbf16, #tpu.memory_space<vmem>>, %arg5: memref<256x64xf32, #tpu.memory_space<vmem>>) attributes {dimension_semantics = [#tpu.dimension_semantics<parallel>], iteration_bounds = array<i64: 3>, scalar_prefetch = 0 : i64, scratch_operands = 0 : i64, tpu.core_type = #tpu.core_type<tc>, window_params = [{transform_indices = @transform_0, window_bounds = array<i64: 256, 128>}, {pipeline_mode = #tpu.pipeline_mode<synchronous>, transform_indices = @transform_1, window_bounds = array<i64: 1, 128>}, {pipeline_mode = #tpu.pipeline_mode<synchronous>, transform_indices = @transform_2, window_bounds = array<i64: 1, 128>}, {pipeline_mode = #tpu.pipeline_mode<synchronous>, transform_indices = @transform_3, window_bounds = array<i64: 128, 64>}, {transform_indices = @transform_4, window_bounds = array<i64: 256, 64>}]} {
    %c0 = arith.constant 0 : index
    %c0_0 = arith.constant 0 : index
    %0 = vector.load %arg1[%c0, %c0_0] : memref<256x128xf32, #tpu.memory_space<vmem>>, vector<256x128xf32>
    %cst = arith.constant dense<0.000000e+00> : vector<256xf32>
    %1 = vector.multi_reduction <add>, %0, %cst [1] : vector<256x128xf32> to vector<256xf32>
    %2 = vector.shape_cast %1 : vector<256xf32> to vector<256x1xf32>
    %cst_1 = arith.constant 1.280000e+02 : f32
    %3 = vector.broadcast %cst_1 : f32 to vector<256x1xf32>
    %4 = arith.divf %2, %3 : vector<256x1xf32>
    %5 = vector.broadcast %4 : vector<256x1xf32> to vector<256x128xf32>
    %6 = arith.subf %0, %5 : vector<256x128xf32>
    %7 = arith.mulf %6, %6 : vector<256x128xf32>
    %cst_2 = arith.constant dense<0.000000e+00> : vector<256xf32>
    %8 = vector.multi_reduction <add>, %7, %cst_2 [1] : vector<256x128xf32> to vector<256xf32>
    %9 = vector.shape_cast %8 : vector<256xf32> to vector<256x1xf32>
    %cst_3 = arith.constant 1.280000e+02 : f32
    %10 = vector.broadcast %cst_3 : f32 to vector<256x1xf32>
    %11 = arith.divf %9, %10 : vector<256x1xf32>
    %12 = vector.broadcast %4 : vector<256x1xf32> to vector<256x128xf32>
    %13 = arith.subf %0, %12 : vector<256x128xf32>
    %cst_4 = arith.constant 9.99999974E-6 : f32
    %14 = vector.broadcast %cst_4 : f32 to vector<256x1xf32>
    %15 = arith.addf %11, %14 : vector<256x1xf32>
    %16 = math.rsqrt %15 : vector<256x1xf32>
    %17 = vector.broadcast %16 : vector<256x1xf32> to vector<256x128xf32>
    %18 = arith.mulf %13, %17 : vector<256x128xf32>
    %c0_5 = arith.constant 0 : index
    %c0_6 = arith.constant 0 : index
    %19 = vector.load %arg2[%c0_5, %c0_6] : memref<1x128xf32, #tpu.memory_space<vmem>>, vector<1x128xf32>
    %20 = vector.broadcast %19 : vector<1x128xf32> to vector<256x128xf32>
    %21 = arith.mulf %18, %20 : vector<256x128xf32>
    %c0_7 = arith.constant 0 : index
    %c0_8 = arith.constant 0 : index
    %22 = vector.load %arg3[%c0_7, %c0_8] : memref<1x128xf32, #tpu.memory_space<vmem>>, vector<1x128xf32>
    %23 = vector.broadcast %22 : vector<1x128xf32> to vector<256x128xf32>
    %24 = arith.addf %21, %23 : vector<256x128xf32>
    %25 = arith.truncf %24 : vector<256x128xf32> to vector<256x128xbf16>
    %c0_9 = arith.constant 0 : index
    %c0_10 = arith.constant 0 : index
    %26 = vector.load %arg4[%c0_9, %c0_10] : memref<128x64xbf16, #tpu.memory_space<vmem>>, vector<128x64xbf16>
    %cst_11 = arith.constant dense<0.000000e+00> : vector<256x64xf32>
    %27 = tpu.matmul %25, %26, %cst_11 {dimension_numbers = #tpu.dot_dimension_numbers<[1], [0], [0], [1], [0, 0, 1, 1], [], []>} : vector<256x128xbf16>, vector<128x64xbf16>, vector<256x64xf32> -> vector<256x64xf32>
    %c0_12 = arith.constant 0 : index
    %c0_13 = arith.constant 0 : index
    %28 = vector.load %arg5[%c0_12, %c0_13] : memref<256x64xf32, #tpu.memory_space<vmem>>, vector<256x64xf32>
    tpu.vector_store %arg5[%c0_12, %c0_13], %27 {strides = array<i32>} : memref<256x64xf32, #tpu.memory_space<vmem>>, vector<256x64xf32>,
    return
  }
  func.func @transform_0(%arg0: i32) -> (i32, i32) {
    %c0_i32 = arith.constant 0 : i32
    %c0_i32_0 = arith.constant 0 : i32
    return %arg0, %c0_i32 : i32, i32
  }
  func.func @transform_1(%arg0: i32) -> (i32, i32) {
    %c0_i32 = arith.constant 0 : i32
    %c0_i32_0 = arith.constant 0 : i32
    %c0_i32_1 = arith.constant 0 : i32
    return %c0_i32, %c0_i32_0 : i32, i32
  }
  func.func @transform_2(%arg0: i32) -> (i32, i32) {
    %c0_i32 = arith.constant 0 : i32
    %c0_i32_0 = arith.constant 0 : i32
    %c0_i32_1 = arith.constant 0 : i32
    return %c0_i32, %c0_i32_0 : i32, i32
  }
  func.func @transform_3(%arg0: i32) -> (i32, i32) {
    %c0_i32 = arith.constant 0 : i32
    %c0_i32_0 = arith.constant 0 : i32
    %c0_i32_1 = arith.constant 0 : i32
    return %c0_i32, %c0_i32_0 : i32, i32
  }
  func.func @transform_4(%arg0: i32) -> (i32, i32) {
    %c0_i32 = arith.constant 0 : i32
    %c0_i32_0 = arith.constant 0 : i32
    return %arg0, %c0_i32 : i32, i32
  }
}

</mosaic_0001>

<bundles_post_ra>
// kernel: patch_merging_forward.1
= control target key start
LH: loop header
LB: loop body
LE: loop exit
PB: predicated region body
PF: predicated region fallthrough
CT: control target
= control target key end

     0   :  { %s1695_s15 = smov 0   ;;  %s1697_s16 = smov 0   ;;  %s2358_s0 = inlined_call_operand.vmem [shape: f32[712,128], index: 0, kind: input, shape index: {}]   ;;  %s2359_s1 = inlined_call_operand.vmem [shape: f32[1,128], index: 1, kind: input, shape index: {}]   ;;  %s2360_s2 = inlined_call_operand.vmem [shape: f32[1,128], index: 2, kind: input, shape index: {}]   ;;  %s2361_s3 = inlined_call_operand.vmem [shape: bf16[128,64], index: 3, kind: input, shape index: {}]   ;;  %s2362_s4 = inlined_call_operand.vmem [shape: f32[712,64], index: 4, kind: output, shape index: {}]  }
   0x1   :  { %s1699_s17 = smov 0  }
   0x2 LB: > { %s1708_s18 = sadd.s32 4294967295, %s1636_s17   ;;  %s1710_s19 = sadd.s32 1, %s1636_s17   ;;  %s1636_s17 = sphi %s1699_s17, %s2371_s17   ;;  %s1632_s16 = sphi %s1697_s16, %s2370_s16   ;;  %s1628_s15 = sphi %s1695_s15, %s2369_s15  }
   0x3   : > { %s107_s20 = ssub.s32 %s1636_s17, %s1710_s19  ;;  %s110_s21 = sadd.s32 1, %s1632_s16 }
   0x4   : > { %p108_p0 = scmp.eq.s32.totalorder %s107_s20, 0  ;;  %p120_p1 = scmp.ne.s32.totalorder %s1632_s16, %s1628_s15 }
   0x5   : > { %p121_p2 = scmp.eq.s32.totalorder %s1708_s18, 2  ;;  %p1300_p3 = scmp.ge.s32.totalorder %s1636_s17, 1 }
   0x6   : > { %s1718_s22 = scalar_select %p108_p0, %s1632_s16, %s110_s21  }
   0x7   : > { %p1720_p4 = por %p121_p2, %p120_p1  ;;  %p171_p5 = scmp.lt.s32.totalorder %s1636_s17, 4 }
   0x9   : > { %p172_p6 = pnand %p1300_p3, %p171_p5 }
   0xa   : > { %s1725_s24 = sshll.u32 (!%p172_p6), %s1708_s18, 5  ;;  %s197_s5 = sand.u32 (!%p172_p6), 1, %s1628_s15  }
   0xb   : > { %175 = sbr.rel (%p172_p6) target bundleno = 641 (0x281), region = 36  ;;  %p205_p7 = scmp.lt.s32.totalorder (!%p172_p6), %s1725_s24, 88 }
   0xc   : > { %s1301_s6 = sshll.u32 (!%p172_p6), %s197_s5, 8 }
   0xd   : > { %s2153_s7 = scalar_lea.vmem (!%p172_p6), [#allocation2], %s1301_s6  }
  0x10   : > { %s206_s25 = scalar_select %p205_p7, %s1725_s24, 88  ;;  %vm924_vm0 = vcmask 523264  }
  0x11   : > { %s965_s15 = ssub.s32 (%p1720_p4), 89, %s1725_s24  ;;  %s1331_s8 = sshll.u32 (%p1720_p4), %s1708_s18, 8 }
  0x12   : > { %s1303_s26 = sshll.u32 %s206_s25, 3  ;;  %p966_p8 = scmp.lt.s32.totalorder (%p1720_p4), %s965_s15, 32 }
  0x13   : > { %s1732_s29 = scalar_lea.vmem %s2358_s0, %s1303_s26  ;;  %s2226_s11 = scalar_lea.vmem (%p1720_p4), %s2362_s4, %s1331_s8  }
  0x14   : > { %v1735_v0 = vld [vmem:[%s1732_s29] sm:$0xff]  ;;  %v1743_v2 = vld [vmem:[%s1732_s29 + $0x8] sm:$0xff]  ;;  %v1751_v4 = vld [vmem:[%s1732_s29 + $0x10] sm:$0xff] }
  0x15   : > { %v1738_v1 = vld [vmem:[%s1732_s29 + $0x80] sm:$0xff]  ;;  %252 = vadd.xlane.f32.xlu0 %v1735_v0  ;;  %v1746_v3 = vld [vmem:[%s1732_s29 + $0x88] sm:$0xff]  ;;  %v1754_v5 = vld [vmem:[%s1732_s29 + $0x18] sm:$0xff] }
  0x16   : > { %284 = vadd.xlane.f32.xlu1 %v1738_v1  ;;  %v1759_v6 = vld [vmem:[%s1732_s29 + $0x90] sm:$0xff]  ;;  %v1762_v7 = vld [vmem:[%s1732_s29 + $0x98] sm:$0xff]  ;;  %v1767_v8 = vld [vmem:[%s1732_s29 + $0x20] sm:$0xff] }
  0x17   : > { %v1770_v9 = vld [vmem:[%s1732_s29 + $0x28] sm:$0xff]  ;;  %v1775_v10 = vld [vmem:[%s1732_s29 + $0xa0] sm:$0xff]  ;;  %v1783_v12 = vld [vmem:[%s1732_s29 + $0x30] sm:$0xff] }
  0x18   : > { %v1778_v11 = vld [vmem:[%s1732_s29 + $0xa8] sm:$0xff]  ;;  %v1786_v13 = vld [vmem:[%s1732_s29 + $0x38] sm:$0xff]  ;;  %v1791_v14 = vld [vmem:[%s1732_s29 + $0xb0] sm:$0xff] }
  0x19   : > { %254 = vadd.xlane.f32.xlu0 %v1743_v2  ;;  %v1794_v15 = vld [vmem:[%s1732_s29 + $0xb8] sm:$0xff]  ;;  %v1799_v16 = vld [vmem:[%s1732_s29 + $0x40] sm:$0xff]  ;;  %v1802_v17 = vld [vmem:[%s1732_s29 + $0x48] sm:$0xff] }
  0x1a   : > { %286 = vadd.xlane.f32.xlu1 %v1746_v3  ;;  %v1807_v18 = vld [vmem:[%s1732_s29 + $0xc0] sm:$0xff]  ;;  %v1810_v19 = vld [vmem:[%s1732_s29 + $0xc8] sm:$0xff]  ;;  %v1815_v20 = vld [vmem:[%s1732_s29 + $0x50] sm:$0xff] }
  0x1b   : > { %v1818_v21 = vld [vmem:[%s1732_s29 + $0x58] sm:$0xff]  ;;  %v1823_v22 = vld [vmem:[%s1732_s29 + $0xd0] sm:$0xff]  ;;  %v1831_v24 = vld [vmem:[%s1732_s29 + $0x60] sm:$0xff] }
  0x1c   : > { %v1826_v23 = vld [vmem:[%s1732_s29 + $0xd8] sm:$0xff]  ;;  %v1834_v25 = vld [vmem:[%s1732_s29 + $0x68] sm:$0xff]  ;;  %v1839_v26 = vld [vmem:[%s1732_s29 + $0xe0] sm:$0xff] }
  0x1d   : > { %256 = vadd.xlane.f32.xlu0 %v1751_v4  ;;  %v1842_v27 = vld [vmem:[%s1732_s29 + $0xe8] sm:$0xff]  ;;  %v1847_v28 = vld [vmem:[%s1732_s29 + $0x70] sm:$0xff]  ;;  %v1850_v29 = vld [vmem:[%s1732_s29 + $0x78] sm:$0xff] }
  0x1e   : > { %258 = vadd.xlane.f32.xlu1 %v1754_v5  ;;  %v1855_v30 = vld [vmem:[%s1732_s29 + $0xf0] sm:$0xff]  ;;  %v1858_v31 = vld [vmem:[%s1732_s29 + $0xf8] sm:$0xff] }
  0x21   : > { %288 = vadd.xlane.f32.xlu0 %v1759_v6 }
  0x22   : > { %290 = vadd.xlane.f32.xlu1 %v1762_v7 }
  0x25   : > { %260 = vadd.xlane.f32.xlu0 %v1767_v8 }
  0x26   : > { %262 = vadd.xlane.f32.xlu1 %v1770_v9 }
  0x29   : > { %292 = vadd.xlane.f32.xlu0 %v1775_v10 }
  0x2a   : > { %294 = vadd.xlane.f32.xlu1 %v1778_v11 }
  0x2d   : > { %264 = vadd.xlane.f32.xlu0 %v1783_v12 }
  0x2e   : > { %266 = vadd.xlane.f32.xlu1 %v1786_v13 }
  0x31   : > { %296 = vadd.xlane.f32.xlu0 %v1791_v14 }
  0x32   : > { %298 = vadd.xlane.f32.xlu1 %v1794_v15 }
  0x35   : > { %268 = vadd.xlane.f32.xlu0 %v1799_v16 }
  0x36   : > { %270 = vadd.xlane.f32.xlu1 %v1802_v17 }
  0x39   : > { %300 = vadd.xlane.f32.xlu0 %v1807_v18 }
  0x3a   : > { %302 = vadd.xlane.f32.xlu1 %v1810_v19 }
  0x3d   : > { %272 = vadd.xlane.f32.xlu0 %v1815_v20 }
  0x3e   : > { %274 = vadd.xlane.f32.xlu1 %v1818_v21 }
  0x41   : > { %304 = vadd.xlane.f32.xlu0 %v1823_v22 }
  0x42   : > { %306 = vadd.xlane.f32.xlu1 %v1826_v23 }
  0x45   : > { %276 = vadd.xlane.f32.xlu0 %v1831_v24 }
  0x46   : > { %278 = vadd.xlane.f32.xlu1 %v1834_v25 }
  0x49   : > { %308 = vadd.xlane.f32.xlu0 %v1839_v26 }
  0x4a   : > { %310 = vadd.xlane.f32.xlu1 %v1842_v27 }
  0x4d   : > { %280 = vadd.xlane.f32.xlu0 %v1847_v28 }
  0x4e   : > { %282 = vadd.xlane.f32.xlu1 %v1850_v29 }
  0x51   : > { %312 = vadd.xlane.f32.xlu0 %v1855_v30 }
  0x52   : > { %314 = vadd.xlane.f32.xlu1 %v1858_v31 }
  0x9e   : > { %v253_v32 = vpop.xlane.xlu0 %252 }
  0x9f   : > { %v285_v33 = vpop.xlane.xlu1 %284  ;;  %v317_v34 = vmul.f32 0.0078125, %v253_v32 }
  0xa0   : > { %v333_v35 = vmul.f32 0.0078125, %v285_v33 }
  0xa1   : > { %v1863_v36 = vsub.f32 %v1735_v0, %v317_v34 }
  0xa2   : > { %v1866_v37 = vsub.f32 %v1738_v1, %v333_v35  ;;  %v255_v38 = vpop.xlane.xlu0 %254 }
  0xa3   : > { %v287_v39 = vpop.xlane.xlu1 %286  ;;  %v318_v40 = vmul.f32 0.0078125, %v255_v38  ;;  %v381_v41 = vmul.f32 %v1863_v36, %v1863_v36 }
  0xa4   : > { %v334_v42 = vmul.f32 0.0078125, %v287_v39  ;;  %v397_v45 = vmul.f32 %v1866_v37, %v1866_v37 }
  0xa5   : > { %v1871_v43 = vsub.f32 %v1743_v2, %v318_v40  ;;  %413 = vadd.xlane.f32.xlu0 %v381_v41 }
  0xa6   : > { %v1874_v44 = vsub.f32 %v1746_v3, %v334_v42  ;;  %v257_v46 = vpop.xlane.xlu0 %256 }
  0xa7   : > { %v259_v47 = vpop.xlane.xlu1 %258  ;;  %v319_v48 = vmul.f32 0.0078125, %v257_v46  ;;  %v382_v49 = vmul.f32 %v1871_v43, %v1871_v43 }
  0xa8   : > { %v320_v50 = vmul.f32 0.0078125, %v259_v47  ;;  %v398_v53 = vmul.f32 %v1874_v44, %v1874_v44 }
  0xa9   : > { %v1881_v51 = vsub.f32 %v1751_v4, %v319_v48  ;;  %445 = vadd.xlane.f32.xlu0 %v397_v45  ;;  %415 = vadd.xlane.f32.xlu1 %v382_v49 }
  0xaa   : > { %v1884_v52 = vsub.f32 %v1754_v5, %v320_v50  ;;  %v289_v54 = vpop.xlane.xlu0 %288 }
  0xab   : > { %v291_v55 = vpop.xlane.xlu1 %290  ;;  %v335_v56 = vmul.f32 0.0078125, %v289_v54  ;;  %v383_v57 = vmul.f32 %v1881_v51, %v1881_v51 }
  0xac   : > { %v336_v58 = vmul.f32 0.0078125, %v291_v55  ;;  %v384_v61 = vmul.f32 %v1884_v52, %v1884_v52 }
  0xad   : > { %v1891_v59 = vsub.f32 %v1759_v6, %v335_v56  ;;  %447 = vadd.xlane.f32.xlu1 %v398_v53  ;;  %417 = vadd.xlane.f32.xlu0 %v383_v57 }
  0xae   : > { %v1894_v60 = vsub.f32 %v1762_v7, %v336_v58  ;;  %v261_v62 = vpop.xlane.xlu0 %260 }
  0xaf   : > { %v263_v63 = vpop.xlane.xlu1 %262  ;;  %v321_v0 = vmul.f32 0.0078125, %v261_v62  ;;  %v399_v1 = vmul.f32 %v1891_v59, %v1891_v59 }
  0xb0   : > { %v322_v2 = vmul.f32 0.0078125, %v263_v63  ;;  %v400_v5 = vmul.f32 %v1894_v60, %v1894_v60 }
  0xb1   : > { %v1901_v3 = vsub.f32 %v1767_v8, %v321_v0  ;;  %419 = vadd.xlane.f32.xlu1 %v384_v61  ;;  %449 = vadd.xlane.f32.xlu0 %v399_v1  ;;  %v1510_v8 = vld [vmem:[%s2361_s3 + $0x38] sm:$0xff]  }
  0xb2   : > { %v1904_v4 = vsub.f32 %v1770_v9, %v322_v2  ;;  %v293_v6 = vpop.xlane.xlu0 %292  ;;  %1358 = vmatprep.subr.bf16.mxu0 %v1510_v8  ;;  %1406 = vmatprep.subr.bf16.mxu1 %v1510_v8 }
  0xb3   : > { %v295_v7 = vpop.xlane.xlu1 %294  ;;  %v337_v32 = vmul.f32 0.0078125, %v293_v6  ;;  %v385_v33 = vmul.f32 %v1901_v3, %v1901_v3  ;;  %1359 = vmatpush3.bf16.msra.mxu0 %v1510_v8  ;;  %1414 = vmatpush3.bf16.msra.mxu1 %v1510_v8 }
  0xb4   : > { %v338_v34 = vmul.f32 0.0078125, %v295_v7  ;;  %v386_v38 = vmul.f32 %v1904_v4, %v1904_v4 }
  0xb5   : > { %v1914_v35 = vsub.f32 %v1775_v10, %v337_v32  ;;  %451 = vadd.xlane.f32.xlu1 %v400_v5  ;;  %421 = vadd.xlane.f32.xlu0 %v385_v33  ;;  %v1511_v10 = vld [vmem:[%s2361_s3 + $0x30] sm:$0xff]  }
  0xb6   : > { %v1917_v9 = vsub.f32 %v1778_v11, %v338_v34  ;;  %v265_v39 = vpop.xlane.xlu0 %264  ;;  %1360 = vmatprep.subr.bf16.mxu0 %v1511_v10  ;;  %1407 = vmatprep.subr.bf16.mxu1 %v1511_v10 }
  0xb7   : > { %v267_v40 = vpop.xlane.xlu1 %266  ;;  %v323_v41 = vmul.f32 0.0078125, %v265_v39  ;;  %v401_v42 = vmul.f32 %v1914_v35, %v1914_v35  ;;  %1361 = vmatpush3.bf16.msra.mxu0 %v1511_v10  ;;  %1415 = vmatpush3.bf16.msra.mxu1 %v1511_v10 }
  0xb8   : > { %v324_v45 = vmul.f32 0.0078125, %v267_v40  ;;  %v402_v47 = vmul.f32 %v1917_v9, %v1917_v9 }
  0xb9   : > { %v1927_v11 = vsub.f32 %v1783_v12, %v323_v41  ;;  %423 = vadd.xlane.f32.xlu1 %v386_v38  ;;  %453 = vadd.xlane.f32.xlu0 %v401_v42  ;;  %v1512_v12 = vld [vmem:[%s2361_s3 + $0x28] sm:$0xff]  }
  0xba   : > { %v1930_v46 = vsub.f32 %v1786_v13, %v324_v45  ;;  %v297_v48 = vpop.xlane.xlu0 %296  ;;  %1362 = vmatprep.subr.bf16.mxu0 %v1512_v12  ;;  %1408 = vmatprep.subr.bf16.mxu1 %v1512_v12 }
  0xbb   : > { %v299_v49 = vpop.xlane.xlu1 %298  ;;  %v339_v50 = vmul.f32 0.0078125, %v297_v48  ;;  %v387_v53 = vmul.f32 %v1927_v11, %v1927_v11  ;;  %1363 = vmatpush3.bf16.msra.mxu0 %v1512_v12  ;;  %1416 = vmatpush3.bf16.msra.mxu1 %v1512_v12 }
  0xbc   : > { %v340_v54 = vmul.f32 0.0078125, %v299_v49  ;;  %v388_v56 = vmul.f32 %v1930_v46, %v1930_v46 }
  0xbd   : > { %v1940_v13 = vsub.f32 %v1791_v14, %v339_v50  ;;  %455 = vadd.xlane.f32.xlu1 %v402_v47  ;;  %425 = vadd.xlane.f32.xlu0 %v387_v53  ;;  %v1513_v14 = vld [vmem:[%s2361_s3 + $0x20] sm:$0xff]  }
  0xbe   : > { %v1943_v55 = vsub.f32 %v1794_v15, %v340_v54  ;;  %v269_v57 = vpop.xlane.xlu0 %268  ;;  %1364 = vmatprep.subr.bf16.mxu0 %v1513_v14  ;;  %1409 = vmatprep.subr.bf16.mxu1 %v1513_v14 }
  0xbf   : > { %v271_v58 = vpop.xlane.xlu1 %270  ;;  %v325_v61 = vmul.f32 0.0078125, %v269_v57  ;;  %v403_v62 = vmul.f32 %v1940_v13, %v1940_v13  ;;  %1365 = vmatpush3.bf16.msra.mxu0 %v1513_v14  ;;  %1417 = vmatpush3.bf16.msra.mxu1 %v1513_v14 }
  0xc0   : > { %v326_v63 = vmul.f32 0.0078125, %v271_v58  ;;  %v404_v1 = vmul.f32 %v1943_v55, %v1943_v55 }
  0xc1   : > { %v1953_v15 = vsub.f32 %v1799_v16, %v325_v61  ;;  %427 = vadd.xlane.f32.xlu1 %v388_v56  ;;  %457 = vadd.xlane.f32.xlu0 %v403_v62  ;;  %v1514_v16 = vld [vmem:[%s2361_s3 + $0x18] sm:$0xff]  }
  0xc2   : > { %v1956_v0 = vsub.f32 %v1802_v17, %v326_v63  ;;  %v301_v2 = vpop.xlane.xlu0 %300  ;;  %1366 = vmatprep.subr.bf16.mxu0 %v1514_v16  ;;  %1410 = vmatprep.subr.bf16.mxu1 %v1514_v16 }
  0xc3   : > { %v303_v5 = vpop.xlane.xlu1 %302  ;;  %v341_v6 = vmul.f32 0.0078125, %v301_v2  ;;  %v389_v7 = vmul.f32 %v1953_v15, %v1953_v15  ;;  %1367 = vmatpush3.bf16.msra.mxu0 %v1514_v16  ;;  %1418 = vmatpush3.bf16.msra.mxu1 %v1514_v16 }
  0xc4   : > { %v342_v32 = vmul.f32 0.0078125, %v303_v5  ;;  %v390_v34 = vmul.f32 %v1956_v0, %v1956_v0 }
  0xc5   : > { %v1966_v17 = vsub.f32 %v1807_v18, %v341_v6  ;;  %459 = vadd.xlane.f32.xlu1 %v404_v1  ;;  %429 = vadd.xlane.f32.xlu0 %v389_v7  ;;  %v1515_v18 = vld [vmem:[%s2361_s3 + $0x10] sm:$0xff]  }
  0xc6   : > { %v1969_v33 = vsub.f32 %v1810_v19, %v342_v32  ;;  %v273_v8 = vpop.xlane.xlu0 %272  ;;  %1368 = vmatprep.subr.bf16.mxu0 %v1515_v18  ;;  %1411 = vmatprep.subr.bf16.mxu1 %v1515_v18 }
  0xc7   : > { %v275_v38 = vpop.xlane.xlu1 %274  ;;  %v327_v39 = vmul.f32 0.0078125, %v273_v8  ;;  %v405_v40 = vmul.f32 %v1966_v17, %v1966_v17  ;;  %1369 = vmatpush3.bf16.msra.mxu0 %v1515_v18  ;;  %1419 = vmatpush3.bf16.msra.mxu1 %v1515_v18 }
  0xc8   : > { %v328_v41 = vmul.f32 0.0078125, %v275_v38  ;;  %v406_v45 = vmul.f32 %v1969_v33, %v1969_v33 }
  0xc9   : > { %v1979_v19 = vsub.f32 %v1815_v20, %v327_v39  ;;  %431 = vadd.xlane.f32.xlu1 %v390_v34  ;;  %461 = vadd.xlane.f32.xlu0 %v405_v40  ;;  %v1516_v20 = vld [vmem:[%s2361_s3 + $0x8] sm:$0xff]  }
  0xca   : > { %v1982_v42 = vsub.f32 %v1818_v21, %v328_v41  ;;  %v305_v10 = vpop.xlane.xlu0 %304  ;;  %1370 = vmatprep.subr.bf16.mxu0 %v1516_v20  ;;  %1412 = vmatprep.subr.bf16.mxu1 %v1516_v20 }
  0xcb   : > { %v307_v47 = vpop.xlane.xlu1 %306  ;;  %v343_v48 = vmul.f32 0.0078125, %v305_v10  ;;  %v391_v49 = vmul.f32 %v1979_v19, %v1979_v19  ;;  %1371 = vmatpush3.bf16.msra.mxu0 %v1516_v20  ;;  %1420 = vmatpush3.bf16.msra.mxu1 %v1516_v20 }
  0xcc   : > { %v344_v50 = vmul.f32 0.0078125, %v307_v47  ;;  %v392_v54 = vmul.f32 %v1982_v42, %v1982_v42 }
  0xcd   : > { %v1992_v21 = vsub.f32 %v1823_v22, %v343_v48  ;;  %463 = vadd.xlane.f32.xlu1 %v406_v45  ;;  %433 = vadd.xlane.f32.xlu0 %v391_v49  ;;  %v1517_v22 = vld [vmem:[%s2361_s3] sm:$0xff]  }
  0xce   : > { %v1995_v53 = vsub.f32 %v1826_v23, %v344_v50  ;;  %v277_v12 = vpop.xlane.xlu0 %276  ;;  %1372 = vmatprep.subr.bf16.mxu0 %v1517_v22  ;;  %1413 = vmatprep.subr.bf16.mxu1 %v1517_v22 }
  0xcf   : > { %v279_v56 = vpop.xlane.xlu1 %278  ;;  %v329_v57 = vmul.f32 0.0078125, %v277_v12  ;;  %v407_v58 = vmul.f32 %v1992_v21, %v1992_v21  ;;  %1373 = vmatpush3.bf16.msra.mxu0 %v1517_v22  ;;  %1421 = vmatpush3.bf16.msra.mxu1 %v1517_v22 }
  0xd0   : > { %v330_v61 = vmul.f32 0.0078125, %v279_v56  ;;  %v408_v63 = vmul.f32 %v1995_v53, %v1995_v53 }
  0xd1   : > { %v2005_v23 = vsub.f32 %v1831_v24, %v329_v57  ;;  %435 = vadd.xlane.f32.xlu1 %v392_v54  ;;  %465 = vadd.xlane.f32.xlu0 %v407_v58 }
  0xd2   : > { %v2008_v62 = vsub.f32 %v1834_v25, %v330_v61  ;;  %v309_v14 = vpop.xlane.xlu0 %308 }
  0xd3   : > { %v311_v1 = vpop.xlane.xlu1 %310  ;;  %v345_v2 = vmul.f32 0.0078125, %v309_v14  ;;  %v393_v5 = vmul.f32 %v2005_v23, %v2005_v23 }
  0xd4   : > { %v346_v6 = vmul.f32 0.0078125, %v311_v1  ;;  %v394_v7 = vmul.f32 %v2008_v62, %v2008_v62 }
  0xd5   : > { %v2015_v24 = vsub.f32 %v1839_v26, %v345_v2  ;;  %467 = vadd.xlane.f32.xlu1 %v408_v63  ;;  %437 = vadd.xlane.f32.xlu0 %v393_v5 }
  0xd6   : > { %v2018_v25 = vsub.f32 %v1842_v27, %v346_v6  ;;  %v281_v32 = vpop.xlane.xlu0 %280 }
  0xd7   : > { %v283_v16 = vpop.xlane.xlu1 %282  ;;  %v331_v34 = vmul.f32 0.0078125, %v281_v32  ;;  %v409_v8 = vmul.f32 %v2015_v24, %v2015_v24 }
  0xd8   : > { %v332_v38 = vmul.f32 0.0078125, %v283_v16  ;;  %v410_v27 = vmul.f32 %v2018_v25, %v2018_v25 }
  0xd9   : > { %v2025_v39 = vsub.f32 %v1847_v28, %v331_v34  ;;  %439 = vadd.xlane.f32.xlu1 %v394_v7  ;;  %469 = vadd.xlane.f32.xlu0 %v409_v8 }
  0xda   : > { %v2028_v26 = vsub.f32 %v1850_v29, %v332_v38  ;;  %v313_v40 = vpop.xlane.xlu0 %312 }
  0xdb   : > { %v315_v41 = vpop.xlane.xlu1 %314  ;;  %v347_v18 = vmul.f32 0.0078125, %v313_v40  ;;  %v395_v45 = vmul.f32 %v2025_v39, %v2025_v39 }
  0xdc   : > { %v348_v10 = vmul.f32 0.0078125, %v315_v41  ;;  %v396_v29 = vmul.f32 %v2028_v26, %v2028_v26 }
  0xdd   : > { %v2035_v47 = vsub.f32 %v1855_v30, %v347_v18  ;;  %471 = vadd.xlane.f32.xlu1 %v410_v27  ;;  %441 = vadd.xlane.f32.xlu0 %v395_v45 }
  0xde   : > { %v2038_v28 = vsub.f32 %v1858_v31, %v348_v10 }
  0xdf   : > { %v411_v48 = vmul.f32 %v2035_v47, %v2035_v47 }
  0xe0   : > { %v412_v49 = vmul.f32 %v2038_v28, %v2038_v28 }
  0xe1   : > { %443 = vadd.xlane.f32.xlu1 %v396_v29  ;;  %473 = vadd.xlane.f32.xlu0 %v411_v48  ;;  %v2050_v29 = vld [vmem:[%s2359_s1] ss:$0 sm:$0xff] }
  0xe5   : > { %475 = vadd.xlane.f32.xlu1 %v412_v49 }
 0x12e   : > { %v414_v50 = vpop.xlane.xlu0 %413 }
 0x12f   : > { %v477_v30 = vmul.f32 0.0078125, %v414_v50 }
 0x131   : > { %v509_v20 = vadd.f32 1e-05, %v477_v30 }
 0x132   : > { %v416_v54 = vpop.xlane.xlu1 %415  ;;  %v446_v12 = vpop.xlane.xlu0 %445 }
 0x133   : > { %1518 = vrsqrt.f32 %v509_v20  ;;  %v478_v31 = vmul.f32 0.0078125, %v416_v54  ;;  %v493_v56 = vmul.f32 0.0078125, %v446_v12 }
 0x135   : > { %v510_v57 = vadd.f32 1e-05, %v478_v31  ;;  %v525_v58 = vadd.f32 1e-05, %v493_v56 }
 0x136   : > { %v448_v61 = vpop.xlane.xlu1 %447  ;;  %v418_v22 = vpop.xlane.xlu0 %417 }
 0x137   : > { %1520 = vrsqrt.f32 %v510_v57  ;;  %v494_v63 = vmul.f32 0.0078125, %v448_v61  ;;  %v479_v14 = vmul.f32 0.0078125, %v418_v22 }
 0x138   : > { %1522 = vrsqrt.f32 %v525_v58 }
 0x139   : > { %v526_v1 = vadd.f32 1e-05, %v494_v63  ;;  %v511_v2 = vadd.f32 1e-05, %v479_v14 }
 0x13a   : > { %v420_v5 = vpop.xlane.xlu1 %419  ;;  %v450_v6 = vpop.xlane.xlu0 %449 }
 0x13b   : > { %1524 = vrsqrt.f32 %v526_v1  ;;  %v480_v7 = vmul.f32 0.0078125, %v420_v5  ;;  %v495_v32 = vmul.f32 0.0078125, %v450_v6 }
 0x13c   : > { %1526 = vrsqrt.f32 %v511_v2 }
 0x13d   : > { %v512_v16 = vadd.f32 1e-05, %v480_v7  ;;  %v527_v34 = vadd.f32 1e-05, %v495_v32 }
 0x13e   : > { %v452_v8 = vpop.xlane.xlu1 %451  ;;  %v422_v38 = vpop.xlane.xlu0 %421 }
 0x13f   : > { %1528 = vrsqrt.f32 %v512_v16  ;;  %v496_v27 = vmul.f32 0.0078125, %v452_v8  ;;  %v481_v40 = vmul.f32 0.0078125, %v422_v38 }
 0x140   : > { %v1519_v41 = vpop.eup %1518  ;;  %1530 = vrsqrt.f32 %v527_v34 }
 0x141   : > { %v528_v18 = vadd.f32 1e-05, %v496_v27  ;;  %v513_v45 = vadd.f32 1e-05, %v481_v40  ;;  %v573_v10 = vmul.f32 %v1519_v41, %v1863_v36  ;;  %v2057_v36 = vld [vmem:[%s2360_s2] ss:$0 sm:$0xff] }
 0x142   : > { %v424_v48 = vpop.xlane.xlu1 %423  ;;  %v454_v49 = vpop.xlane.xlu0 %453 }
 0x143   : > { %1532 = vrsqrt.f32 %v528_v18  ;;  %v482_v50 = vmul.f32 0.0078125, %v424_v48  ;;  %v497_v30 = vmul.f32 0.0078125, %v454_v49  ;;  %v612_v54 = vmul.f32 %v2050_v29, %v573_v10 }
 0x144   : > { %v1521_v20 = vpop.eup %1520  ;;  %1534 = vrsqrt.f32 %v513_v45 }
 0x145   : > { %v1523_v12 = vpop.eup %1522  ;;  %v514_v31 = vadd.f32 1e-05, %v482_v50  ;;  %v529_v56 = vadd.f32 1e-05, %v497_v30  ;;  %v574_v57 = vmul.f32 %v1521_v20, %v1871_v43  ;;  %v651_v5 = vadd.f32 %v2057_v36, %v612_v54 }
 0x146   : > { %v456_v58 = vpop.xlane.xlu1 %455  ;;  %v426_v61 = vpop.xlane.xlu0 %425  ;;  %v589_v22 = vmul.f32 %v1523_v12, %v1866_v37 }
 0x147   : > { %1536 = vrsqrt.f32 %v514_v31  ;;  %v498_v63 = vmul.f32 0.0078125, %v456_v58  ;;  %v483_v14 = vmul.f32 0.0078125, %v426_v61  ;;  %v613_v1 = vmul.f32 %v2050_v29, %v574_v57 }
 0x148   : > { %v1525_v2 = vpop.eup %1524  ;;  %1538 = vrsqrt.f32 %v529_v56  ;;  %v628_v37 = vmul.f32 %v2050_v29, %v589_v22 }
 0x149   : > { %v1527_v6 = vpop.eup %1526  ;;  %v530_v43 = vadd.f32 1e-05, %v498_v63  ;;  %v515_v7 = vadd.f32 1e-05, %v483_v14  ;;  %v652_v32 = vadd.f32 %v2057_v36, %v613_v1  ;;  %v590_v16 = vmul.f32 %v1525_v2, %v1874_v44 }
 0x14a   : > { %v428_v34 = vpop.xlane.xlu1 %427  ;;  %v458_v8 = vpop.xlane.xlu0 %457  ;;  %v575_v38 = vmul.f32 %v1527_v6, %v1881_v51  ;;  %v667_v51 = vadd.f32 %v2057_v36, %v628_v37 }
 0x14b   : > { %1540 = vrsqrt.f32 %v530_v43  ;;  %v484_v27 = vmul.f32 0.0078125, %v428_v34  ;;  %v499_v40 = vmul.f32 0.0078125, %v458_v8  ;;  %v683_v41 = vpack.c.bf16 %v652_v32, %v651_v5 }
 0x14c   : > { %v1529_v18 = vpop.eup %1528  ;;  %1542 = vrsqrt.f32 %v515_v7  ;;  %v629_v45 = vmul.f32 %v2050_v29, %v590_v16  ;;  %v614_v10 = vmul.f32 %v2050_v29, %v575_v38 }
 0x14d   : > { %v1531_v48 = vpop.eup %1530  ;;  %v516_v49 = vadd.f32 1e-05, %v484_v27  ;;  %v531_v50 = vadd.f32 1e-05, %v499_v40  ;;  %1374 = vmatprep.mubr.bf16.mxu0 %v683_v41  ;;  %v576_v44 = vmul.f32 %v1529_v18, %v1884_v52 }
 0x14e   : > { %v460_v30 = vpop.xlane.xlu1 %459  ;;  %v430_v20 = vpop.xlane.xlu0 %429  ;;  %v668_v54 = vadd.f32 %v2057_v36, %v629_v45  ;;  %v591_v12 = vmul.f32 %v1531_v48, %v1891_v59  ;;  %v653_v22 = vadd.f32 %v2057_v36, %v614_v10 }
 0x14f   : > { %1544 = vrsqrt.f32 %v516_v49  ;;  %v500_v31 = vmul.f32 0.0078125, %v460_v30  ;;  %v485_v56 = vmul.f32 0.0078125, %v430_v20  ;;  %v615_v57 = vmul.f32 %v2050_v29, %v576_v44 }
 0x150   : > { %v1533_v58 = vpop.eup %1532  ;;  %1546 = vrsqrt.f32 %v531_v50  ;;  %v691_v61 = vpack.c.bf16 %v668_v54, %v667_v51  ;;  %v630_v6 = vmul.f32 %v2050_v29, %v591_v12 }
 0x151   : > { %v1535_v63 = vpop.eup %1534  ;;  %v532_v52 = vadd.f32 1e-05, %v500_v31  ;;  %v517_v14 = vadd.f32 1e-05, %v485_v56  ;;  %v654_v1 = vadd.f32 %v2057_v36, %v615_v57  ;;  %v592_v2 = vmul.f32 %v1533_v58, %v1894_v60 }
 0x152   : > { %1390 = vmatprep.mubr.bf16.mxu1 %v691_v61  ;;  %v432_v5 = vpop.xlane.xlu1 %431  ;;  %v462_v59 = vpop.xlane.xlu0 %461  ;;  %v577_v43 = vmul.f32 %v1535_v63, %v1901_v3  ;;  %v669_v3 = vadd.f32 %v2057_v36, %v630_v6 }
 0x153   : > { %1548 = vrsqrt.f32 %v532_v52  ;;  %v486_v7 = vmul.f32 0.0078125, %v432_v5  ;;  %v501_v32 = vmul.f32 0.0078125, %v462_v59  ;;  %v684_v16 = vpack.c.bf16 %v654_v1, %v653_v22 }
 0x154   : > { %v1537_v34 = vpop.eup %1536  ;;  %1550 = vrsqrt.f32 %v517_v14  ;;  %v631_v8 = vmul.f32 %v2050_v29, %v592_v2  ;;  %v616_v37 = vmul.f32 %v2050_v29, %v577_v43 }
 0x155   : > { %v1539_v38 = vpop.eup %1538  ;;  %v518_v27 = vadd.f32 1e-05, %v486_v7  ;;  %v533_v60 = vadd.f32 1e-05, %v501_v32  ;;  %1375 = vmatmul.mubr.bf16.vlgmr.msra.gmra.mxu0 %v684_v16  ;;  %v578_v40 = vmul.f32 %v1537_v34, %v1904_v4 }
 0x156   : > { %v464_v41 = vpop.xlane.xlu1 %463  ;;  %v434_v18 = vpop.xlane.xlu0 %433  ;;  %v670_v45 = vadd.f32 %v2057_v36, %v631_v8  ;;  %v593_v10 = vmul.f32 %v1539_v38, %v1914_v35  ;;  %v655_v20 = vadd.f32 %v2057_v36, %v616_v37 }
 0x157   : > { %1552 = vrsqrt.f32 %v518_v27  ;;  %v502_v48 = vmul.f32 0.0078125, %v464_v41  ;;  %v487_v49 = vmul.f32 0.0078125, %v434_v18  ;;  %v617_v50 = vmul.f32 %v2050_v29, %v578_v40 }
 0x158   : > { %v1541_v44 = vpop.eup %1540  ;;  %1554 = vrsqrt.f32 %v533_v60  ;;  %v692_v30 = vpack.c.bf16 %v670_v45, %v669_v3  ;;  %v632_v57 = vmul.f32 %v2050_v29, %v593_v10 }
 0x159   : > { %v1543_v51 = vpop.eup %1542  ;;  %v534_v4 = vadd.f32 1e-05, %v502_v48  ;;  %v519_v54 = vadd.f32 1e-05, %v487_v49  ;;  %v656_v12 = vadd.f32 %v2057_v36, %v617_v50  ;;  %v594_v31 = vmul.f32 %v1541_v44, %v1917_v9 }
 0x15a   : > { %1391 = vmatmul.mubr.bf16.vlgmr.msra.gmra.mxu1 %v692_v30  ;;  %v436_v56 = vpop.xlane.xlu1 %435  ;;  %v466_v35 = vpop.xlane.xlu0 %465  ;;  %v579_v58 = vmul.f32 %v1543_v51, %v1927_v11  ;;  %v671_v11 = vadd.f32 %v2057_v36, %v632_v57 }
 0x15b   : > { %1556 = vrsqrt.f32 %v534_v4  ;;  %v488_v61 = vmul.f32 0.0078125, %v436_v56  ;;  %v503_v22 = vmul.f32 0.0078125, %v466_v35  ;;  %v685_v63 = vpack.c.bf16 %v656_v12, %v655_v20 }
 0x15c   : > { %v1545_v52 = vpop.eup %1544  ;;  %1558 = vrsqrt.f32 %v519_v54  ;;  %v633_v14 = vmul.f32 %v2050_v29, %v594_v31  ;;  %v618_v1 = vmul.f32 %v2050_v29, %v579_v58 }
 0x15d   : > { %v1547_v2 = vpop.eup %1546  ;;  %v520_v5 = vadd.f32 1e-05, %v488_v61  ;;  %v535_v9 = vadd.f32 1e-05, %v503_v22  ;;  %1378 = vmatprep.mubr.bf16.mxu0 %v685_v63  ;;  %v580_v59 = vmul.f32 %v1545_v52, %v1930_v46 }
 0x15e   : > { %v468_v6 = vpop.xlane.xlu1 %467  ;;  %v438_v43 = vpop.xlane.xlu0 %437  ;;  %v672_v7 = vadd.f32 %v2057_v36, %v633_v14  ;;  %v595_v32 = vmul.f32 %v1547_v2, %v1940_v13  ;;  %v657_v27 = vadd.f32 %v2057_v36, %v618_v1 }
 0x15f   : > { %1560 = vrsqrt.f32 %v520_v5  ;;  %v504_v16 = vmul.f32 0.0078125, %v468_v6  ;;  %v489_v34 = vmul.f32 0.0078125, %v438_v43  ;;  %v619_v8 = vmul.f32 %v2050_v29, %v580_v59 }
 0x160   : > { %v1549_v37 = vpop.eup %1548  ;;  %1562 = vrsqrt.f32 %v535_v9  ;;  %v693_v38 = vpack.c.bf16 %v672_v7, %v671_v11  ;;  %v634_v45 = vmul.f32 %v2050_v29, %v595_v32 }
 0x161   : > { %v1551_v60 = vpop.eup %1550  ;;  %v536_v46 = vadd.f32 1e-05, %v504_v16  ;;  %v521_v40 = vadd.f32 1e-05, %v489_v34  ;;  %v658_v41 = vadd.f32 %v2057_v36, %v619_v8  ;;  %v596_v18 = vmul.f32 %v1549_v37, %v1943_v55 }
 0x162   : > { %1394 = vmatprep.mubr.bf16.mxu1 %v693_v38  ;;  %v440_v3 = vpop.xlane.xlu1 %439  ;;  %v470_v13 = vpop.xlane.xlu0 %469  ;;  %v581_v10 = vmul.f32 %v1551_v60, %v1953_v15  ;;  %v673_v15 = vadd.f32 %v2057_v36, %v634_v45 }
 0x163   : > { %1564 = vrsqrt.f32 %v536_v46  ;;  %v490_v48 = vmul.f32 0.0078125, %v440_v3  ;;  %v505_v49 = vmul.f32 0.0078125, %v470_v13  ;;  %v686_v50 = vpack.c.bf16 %v658_v41, %v657_v27 }
 0x164   : > { %v1553_v44 = vpop.eup %1552  ;;  %1566 = vrsqrt.f32 %v521_v40  ;;  %v635_v30 = vmul.f32 %v2050_v29, %v596_v18  ;;  %v620_v20 = vmul.f32 %v2050_v29, %v581_v10 }
 0x165   : > { %v1555_v51 = vpop.eup %1554  ;;  %v522_v4 = vadd.f32 1e-05, %v490_v48  ;;  %v537_v55 = vadd.f32 1e-05, %v505_v49  ;;  %1379 = vmatmul.mubr.bf16.gmra.mxu0 %v686_v50  ;;  %v582_v54 = vmul.f32 %v1553_v44, %v1956_v0 }
 0x166   : > { %v472_v12 = vpop.xlane.xlu1 %471  ;;  %v442_v31 = vpop.xlane.xlu0 %441  ;;  %v674_v56 = vadd.f32 %v2057_v36, %v635_v30  ;;  %v597_v35 = vmul.f32 %v1555_v51, %v1966_v17  ;;  %v659_v52 = vadd.f32 %v2057_v36, %v620_v20 }
 0x167   : > { %1568 = vrsqrt.f32 %v522_v4  ;;  %v506_v57 = vmul.f32 0.0078125, %v472_v12  ;;  %v491_v58 = vmul.f32 0.0078125, %v442_v31  ;;  %v621_v61 = vmul.f32 %v2050_v29, %v582_v54 }
 0x168   : > { %v1557_v22 = vpop.eup %1556  ;;  %1570 = vrsqrt.f32 %v537_v55  ;;  %v694_v63 = vpack.c.bf16 %v674_v56, %v673_v15  ;;  %v636_v59 = vmul.f32 %v2050_v29, %v597_v35 }
 0x169   : > { %v1559_v14 = vpop.eup %1558  ;;  %v538_v0 = vadd.f32 1e-05, %v506_v57  ;;  %v523_v1 = vadd.f32 1e-05, %v491_v58  ;;  %v660_v2 = vadd.f32 %v2057_v36, %v621_v61  ;;  %v598_v5 = vmul.f32 %v1557_v22, %v1969_v33 }
 0x16a   : > { %1395 = vmatmul.mubr.bf16.gmra.mxu1 %v694_v63  ;;  %v444_v9 = vpop.xlane.xlu1 %443  ;;  %v474_v17 = vpop.xlane.xlu0 %473  ;;  %v583_v6 = vmul.f32 %v1559_v14, %v1979_v19  ;;  %v675_v60 = vadd.f32 %v2057_v36, %v636_v59 }
 0x16b   : > { %1572 = vrsqrt.f32 %v538_v0  ;;  %v492_v43 = vmul.f32 0.0078125, %v444_v9  ;;  %v507_v11 = vmul.f32 0.0078125, %v474_v17  ;;  %v687_v7 = vpack.c.bf16 %v660_v2, %v659_v52 }
 0x16c   : > { %v1561_v32 = vpop.eup %1560  ;;  %1574 = vrsqrt.f32 %v523_v1  ;;  %v637_v16 = vmul.f32 %v2050_v29, %v598_v5  ;;  %v622_v34 = vmul.f32 %v2050_v29, %v583_v6 }
 0x16d   : > { %v1563_v8 = vpop.eup %1562  ;;  %v524_v37 = vadd.f32 1e-05, %v492_v43  ;;  %v539_v33 = vadd.f32 1e-05, %v507_v11  ;;  %1382 = vmatprep.mubr.bf16.mxu0 %v687_v7  ;;  %v584_v38 = vmul.f32 %v1561_v32, %v1982_v42 }
 0x16e   : > { %v476_v27 = vpop.xlane.xlu1 %475  ;;  %v676_v19 = vadd.f32 %v2057_v36, %v637_v16  ;;  %v599_v46 = vmul.f32 %v1563_v8, %v1992_v21  ;;  %v661_v13 = vadd.f32 %v2057_v36, %v622_v34 }
 0x16f   : > { %1576 = vrsqrt.f32 %v524_v37  ;;  %v508_v40 = vmul.f32 0.0078125, %v476_v27  ;;  %v623_v41 = vmul.f32 %v2050_v29, %v584_v38 }
 0x170   : > { %v1565_v18 = vpop.eup %1564  ;;  %1578 = vrsqrt.f32 %v539_v33  ;;  %v695_v3 = vpack.c.bf16 %v676_v19, %v675_v60  ;;  %v638_v49 = vmul.f32 %v2050_v29, %v599_v46 }
 0x171   : > { %v1567_v45 = vpop.eup %1566  ;;  %v540_v10 = vadd.f32 1e-05, %v508_v40  ;;  %v662_v42 = vadd.f32 %v2057_v36, %v623_v41  ;;  %v600_v48 = vmul.f32 %v1565_v18, %v1995_v53 }
 0x172   : > { %1398 = vmatprep.mubr.bf16.mxu1 %v695_v3  ;;  %v585_v21 = vmul.f32 %v1567_v45, %v2005_v23  ;;  %v677_v51 = vadd.f32 %v2057_v36, %v638_v49 }
 0x173   : > { %1580 = vrsqrt.f32 %v540_v10  ;;  %v688_v50 = vpack.c.bf16 %v662_v42, %v661_v13  ;;  %v639_v44 = vmul.f32 %v2050_v29, %v600_v48 }
 0x174   : > { %v1569_v30 = vpop.eup %1568  ;;  %v624_v53 = vmul.f32 %v2050_v29, %v585_v21 }
 0x175   : > { %v1571_v20 = vpop.eup %1570  ;;  %1383 = vmatmul.mubr.bf16.gmra.mxu0 %v688_v50  ;;  %v678_v4 = vadd.f32 %v2057_v36, %v639_v44  ;;  %v586_v55 = vmul.f32 %v1569_v30, %v2008_v62 }
 0x176   : > { %v601_v54 = vmul.f32 %v1571_v20, %v2015_v24  ;;  %v663_v56 = vadd.f32 %v2057_v36, %v624_v53 }
 0x177   : > { %v696_v12 = vpack.c.bf16 %v678_v4, %v677_v51  ;;  %v625_v23 = vmul.f32 %v2050_v29, %v586_v55 }
 0x178   : > { %v1573_v31 = vpop.eup %1572  ;;  %v640_v58 = vmul.f32 %v2050_v29, %v601_v54 }
 0x179   : > { %v1575_v15 = vpop.eup %1574  ;;  %1399 = vmatmul.mubr.bf16.gmra.mxu1 %v696_v12  ;;  %v664_v35 = vadd.f32 %v2057_v36, %v625_v23  ;;  %v602_v57 = vmul.f32 %v1573_v31, %v2018_v25 }
 0x17a   : > { %v587_v62 = vmul.f32 %v1575_v15, %v2025_v39  ;;  %v679_v52 = vadd.f32 %v2057_v36, %v640_v58 }
 0x17b   : > { %v689_v61 = vpack.c.bf16 %v664_v35, %v663_v56  ;;  %v641_v22 = vmul.f32 %v2050_v29, %v602_v57 }
 0x17c   : > { %v1577_v24 = vpop.eup %1576  ;;  %v626_v1 = vmul.f32 %v2050_v29, %v587_v62 }
 0x17d   : > { %v1579_v63 = vpop.eup %1578  ;;  %1386 = vmatprep.mubr.bf16.mxu0 %v689_v61  ;;  %v680_v14 = vadd.f32 %v2057_v36, %v641_v22  ;;  %v588_v0 = vmul.f32 %v1577_v24, %v2028_v26 }
 0x17e   : > { %v603_v25 = vmul.f32 %v1579_v63, %v2035_v47  ;;  %v665_v9 = vadd.f32 %v2057_v36, %v626_v1 }
 0x17f   : > { %v697_v2 = vpack.c.bf16 %v680_v14, %v679_v52  ;;  %v627_v39 = vmul.f32 %v2050_v29, %v588_v0 }
 0x180   : > { %v1581_v5 = vpop.eup %1580  ;;  %v642_v6 = vmul.f32 %v2050_v29, %v603_v25 }
 0x181   : > { %1402 = vmatprep.mubr.bf16.mxu1 %v697_v2  ;;  %v666_v17 = vadd.f32 %v2057_v36, %v627_v39  ;;  %v604_v59 = vmul.f32 %v1581_v5, %v2038_v28 }
 0x182   : > { %v681_v47 = vadd.f32 %v2057_v36, %v642_v6 }
 0x183   : > { %v690_v43 = vpack.c.bf16 %v666_v17, %v665_v9  ;;  %v643_v26 = vmul.f32 %v2050_v29, %v604_v59 }
 0x185   : > { %1387 = vmatmul.mubr.bf16.gmra.mxu0 %v690_v43  ;;  %v682_v11 = vadd.f32 %v2057_v36, %v643_v26 }
 0x187   : > { %v698_v7 = vpack.c.bf16 %v682_v11, %v681_v47 }
 0x189   : > { %1403 = vmatmul.mubr.bf16.gmra.mxu1 %v698_v7 }
 0x215   : > { %v1376_v32 = vpop.f32.mrf.mxu0 }
 0x216   : > { %927 = vst.msk [vmem:[%s2153_s7 + $0x10] sm:$0xff] %vm924_vm0, %v1376_v32 }
 0x217   : > { %v797_v28 = vpop.f32.mrf.mxu0 }
 0x218   : > { %925 = vst.msk [vmem:[%s2153_s7] sm:$0xff] %vm924_vm0, %v797_v28 }
 0x219   : > { %v1377_v29 = vpop.f32.mrf.mxu0 }
 0x21a   : > { %928 = vst.msk [vmem:[%s2153_s7 + $0x18] sm:$0xff] %vm924_vm0, %v1377_v29  ;;  %v1392_v36 = vpop.f32.mrf.mxu1 }
 0x21b   : > { %943 = vst.msk [vmem:[%s2153_s7 + $0x90] sm:$0xff] %vm924_vm0, %v1392_v36  ;;  %v800_v16 = vpop.f32.mrf.mxu0 }
 0x21c   : > { %926 = vst.msk [vmem:[%s2153_s7 + $0x8] sm:$0xff] %vm924_vm0, %v800_v16  ;;  %v861_v34 = vpop.f32.mrf.mxu1 }
 0x21d   : > { %941 = vst.msk [vmem:[%s2153_s7 + $0x80] sm:$0xff] %vm924_vm0, %v861_v34 }
 0x21e   : > { %v1393_v8 = vpop.f32.mrf.mxu1 }
 0x21f   : > { %944 = vst.msk [vmem:[%s2153_s7 + $0x98] sm:$0xff] %vm924_vm0, %v1393_v8 }
 0x220   : > { %v864_v37 = vpop.f32.mrf.mxu1 }
 0x221   : > { %942 = vst.msk [vmem:[%s2153_s7 + $0x88] sm:$0xff] %vm924_vm0, %v864_v37 }
 0x225   : > { %v1380_v33 = vpop.f32.mrf.mxu0 }
 0x226   : > { %931 = vst.msk [vmem:[%s2153_s7 + $0x30] sm:$0xff] %vm924_vm0, %v1380_v33 }
 0x227   : > { %v813_v38 = vpop.f32.mrf.mxu0 }
 0x228   : > { %929 = vst.msk [vmem:[%s2153_s7 + $0x20] sm:$0xff] %vm924_vm0, %v813_v38 }
 0x229   : > { %v1381_v27 = vpop.f32.mrf.mxu0 }
 0x22a   : > { %932 = vst.msk [vmem:[%s2153_s7 + $0x38] sm:$0xff] %vm924_vm0, %v1381_v27  ;;  %v1396_v60 = vpop.f32.mrf.mxu1 }
 0x22b   : > { %947 = vst.msk [vmem:[%s2153_s7 + $0xb0] sm:$0xff] %vm924_vm0, %v1396_v60  ;;  %v816_v19 = vpop.f32.mrf.mxu0 }
 0x22c   : > { %930 = vst.msk [vmem:[%s2153_s7 + $0x28] sm:$0xff] %vm924_vm0, %v816_v19  ;;  %v877_v46 = vpop.f32.mrf.mxu1 }
 0x22d   : > { %945 = vst.msk [vmem:[%s2153_s7 + $0xa0] sm:$0xff] %vm924_vm0, %v877_v46 }
 0x22e   : > { %v1397_v40 = vpop.f32.mrf.mxu1 }
 0x22f   : > { %948 = vst.msk [vmem:[%s2153_s7 + $0xb8] sm:$0xff] %vm924_vm0, %v1397_v40 }
 0x230   : > { %v880_v41 = vpop.f32.mrf.mxu1 }
 0x231   : > { %946 = vst.msk [vmem:[%s2153_s7 + $0xa8] sm:$0xff] %vm924_vm0, %v880_v41 }
 0x235   : > { %v1384_v18 = vpop.f32.mrf.mxu0 }
 0x236   : > { %935 = vst.msk [vmem:[%s2153_s7 + $0x50] sm:$0xff] %vm924_vm0, %v1384_v18 }
 0x237   : > { %v829_v3 = vpop.f32.mrf.mxu0 }
 0x238   : > { %933 = vst.msk [vmem:[%s2153_s7 + $0x40] sm:$0xff] %vm924_vm0, %v829_v3 }
 0x239   : > { %v1385_v13 = vpop.f32.mrf.mxu0  ;;  %v1400_v45 = vpop.f32.mrf.mxu1 }
 0x23a   : > { %936 = vst.msk [vmem:[%s2153_s7 + $0x58] sm:$0xff] %vm924_vm0, %v1385_v13  ;;  %951 = vst.msk [vmem:[%s2153_s7 + $0xd0] sm:$0xff] %vm924_vm0, %v1400_v45 }
 0x23b   : > { %v832_v10 = vpop.f32.mrf.mxu0  ;;  %v893_v42 = vpop.f32.mrf.mxu1 }
 0x23c   : > { %934 = vst.msk [vmem:[%s2153_s7 + $0x48] sm:$0xff] %vm924_vm0, %v832_v10  ;;  %949 = vst.msk [vmem:[%s2153_s7 + $0xc0] sm:$0xff] %vm924_vm0, %v893_v42 }
 0x23d   : > { %v1401_v48 = vpop.f32.mrf.mxu1 }
 0x23e   : > { %952 = vst.msk [vmem:[%s2153_s7 + $0xd8] sm:$0xff] %vm924_vm0, %v1401_v48 }
 0x23f   : > { %v896_v49 = vpop.f32.mrf.mxu1 }
 0x240   : > { %950 = vst.msk [vmem:[%s2153_s7 + $0xc8] sm:$0xff] %vm924_vm0, %v896_v49 }
 0x245   : > { %v1388_v21 = vpop.f32.mrf.mxu0 }
 0x246   : > { %939 = vst.msk [vmem:[%s2153_s7 + $0x70] sm:$0xff] %vm924_vm0, %v1388_v21 }
 0x247   : > { %v845_v50 = vpop.f32.mrf.mxu0 }
 0x248   : > { %937 = vst.msk [vmem:[%s2153_s7 + $0x60] sm:$0xff] %vm924_vm0, %v845_v50 }
 0x249   : > { %v1389_v44 = vpop.f32.mrf.mxu0  ;;  %v1404_v30 = vpop.f32.mrf.mxu1 }
 0x24a   : > { %940 = vst.msk [vmem:[%s2153_s7 + $0x78] sm:$0xff] %vm924_vm0, %v1389_v44  ;;  %955 = vst.msk [vmem:[%s2153_s7 + $0xf0] sm:$0xff] %vm924_vm0, %v1404_v30 }
 0x24b   : > { %v848_v20 = vpop.f32.mrf.mxu0  ;;  %v909_v51 = vpop.f32.mrf.mxu1 }
 0x24c   : > { %938 = vst.msk [vmem:[%s2153_s7 + $0x68] sm:$0xff] %vm924_vm0, %v848_v20  ;;  %953 = vst.msk [vmem:[%s2153_s7 + $0xe0] sm:$0xff] %vm924_vm0, %v909_v51  ;;  %963 = sbr.rel (!%p1720_p4) target bundleno = 641 (0x281), region = 40 }
 0x24d   : > { %v1405_v4 = vpop.f32.mrf.mxu1 }
 0x24e   : > { %956 = vst.msk [vmem:[%s2153_s7 + $0xf8] sm:$0xff] %vm924_vm0, %v1405_v4 }
 0x24f   : > { %v912_v55 = vpop.f32.mrf.mxu1 }
 0x250   : > { %954 = vst.msk [vmem:[%s2153_s7 + $0xe8] sm:$0xff] %vm924_vm0, %v912_v55 }
 0x251   : > { %s2373_s15 = smov (!%p966_p8, %s965_s15), 32 }
 0x252   : > { %s1316_s12 = sshll.u32 %s2373_s15, 7 }
 0x253   : > { %p1319_p9 = scmp.eq.s32.totalorder %s1316_s12, 0 }
 0x254   : > { %s2232_s13 = sshrl.u32 (!%p1319_p9), %s2373_s15, 5 }
 0x255   : > { %974 = sbr.rel (%p1319_p9) target bundleno = 641 (0x281), region = 44  ;;  %p1320_p10 = scmp.le.s32.totalorder (!%p1319_p9), %s2232_s13, 0 }
 0x25a   : > { %1253 = sbr.rel (%p1320_p10) target bundleno = 624 (0x270), region = 120  ;;  %s2364_s18 = smov (!%p1320_p10), %s2226_s11 }
 0x25b   : > { %s2365_s23 = smov (!%p1320_p10), %s2153_s7  ;;  %s2241_s24 = smov (!%p1320_p10), 0  }
 0x25c   : > { %s2243_s14 = smov (!%p1320_p10), 0  }
 0x25f LB: >> { %v1099_v53 = vld [vmem:[%s1644_s23] sm:$0xff]  ;;  %v1101_v54 = vld [vmem:[%s1644_s23 + $0x8] sm:$0xff]  ;;  %v1103_v12 = vld [vmem:[%s1644_s23 + $0x10] sm:$0xff]  ;;  %s1163_s17 = sadd.s32 1, %s1648_s24  ;;  %s1093_s14 = sadd.s32 1, %s1652_s14   ;;  %s1652_s14 = sphi %s2243_s14, %s1093_s14   ;;  %s1648_s24 = sphi %s2241_s24, %s2368_s24   ;;  %s1644_s23 = sphi %s2365_s23, %s2367_s23   ;;  %s1640_s18 = sphi %s2364_s18, %s2366_s18  }
 0x260   : >> { %1100 = vst [vmem:[%s1640_s18] sm:$0xff] %v1099_v53  ;;  %1102 = vst [vmem:[%s1640_s18 + $0x8] sm:$0xff] %v1101_v54  ;;  %v1105_v23 = vld [vmem:[%s1644_s23 + $0x18] sm:$0xff]  ;;  %v1107_v31 = vld [vmem:[%s1644_s23 + $0x20] sm:$0xff]  ;;  %p1164_p11 = scmp.ge.s32.totalorder %s1163_s17, %s2232_s13  ;;  %p1092_p12 = scmp.ge.s32.totalorder %s1093_s14, %s2232_s13 }
 0x261   : >> { %1104 = vst [vmem:[%s1640_s18 + $0x10] sm:$0xff] %v1103_v12  ;;  %v1109_v15 = vld [vmem:[%s1644_s23 + $0x28] sm:$0xff]  ;;  %1106 = vst [vmem:[%s1640_s18 + $0x18] sm:$0xff] %v1105_v23  ;;  %v1111_v56 = vld [vmem:[%s1644_s23 + $0x30] sm:$0xff] }
 0x262   : >> { %1108 = vst [vmem:[%s1640_s18 + $0x20] sm:$0xff] %v1107_v31  ;;  %1110 = vst [vmem:[%s1640_s18 + $0x28] sm:$0xff] %v1109_v15  ;;  %v1113_v35 = vld [vmem:[%s1644_s23 + $0x38] sm:$0xff]  ;;  %v1115_v57 = vld [vmem:[%s1644_s23 + $0x40] sm:$0xff]  ;;  %s2375_s17 = smov (%p1164_p11, %s1163_s17), 0 }
 0x263   : >> { %1112 = vst [vmem:[%s1640_s18 + $0x30] sm:$0xff] %v1111_v56  ;;  %1114 = vst [vmem:[%s1640_s18 + $0x38] sm:$0xff] %v1113_v35  ;;  %v1117_v58 = vld [vmem:[%s1644_s23 + $0x48] sm:$0xff]  ;;  %v1119_v62 = vld [vmem:[%s1644_s23 + $0x50] sm:$0xff]  ;;  %s1321_s20 = sshll.u32 %s2375_s17, 8  ;;  %s2368_s24 = smov %s2375_s17 }
 0x264   : >> { %1116 = vst [vmem:[%s1640_s18 + $0x40] sm:$0xff] %v1115_v57  ;;  %v1121_v61 = vld [vmem:[%s1644_s23 + $0x58] sm:$0xff]  ;;  %1118 = vst [vmem:[%s1640_s18 + $0x48] sm:$0xff] %v1117_v58  ;;  %v1123_v22 = vld [vmem:[%s1644_s23 + $0x60] sm:$0xff]  ;;  %s2299_s21 = scalar_lea.vmem %s2153_s7, %s1321_s20 [#allocation2]   ;;  %s1169_s25 = scalar_lea.vmem %s2226_s11, %s1321_s20  }
 0x265   : >> { %1120 = vst [vmem:[%s1640_s18 + $0x50] sm:$0xff] %v1119_v62  ;;  %1122 = vst [vmem:[%s1640_s18 + $0x58] sm:$0xff] %v1121_v61  ;;  %v1125_v24 = vld [vmem:[%s1644_s23 + $0x68] sm:$0xff]  ;;  %v1127_v63 = vld [vmem:[%s1644_s23 + $0x70] sm:$0xff] }
 0x266   : >> { %1124 = vst [vmem:[%s1640_s18 + $0x60] sm:$0xff] %v1123_v22  ;;  %1126 = vst [vmem:[%s1640_s18 + $0x68] sm:$0xff] %v1125_v24  ;;  %v1129_v52 = vld [vmem:[%s1644_s23 + $0x78] sm:$0xff]  ;;  %v1131_v14 = vld [vmem:[%s1644_s23 + $0x80] sm:$0xff] }
 0x267   : >> { %1128 = vst [vmem:[%s1640_s18 + $0x70] sm:$0xff] %v1127_v63  ;;  %v1133_v0 = vld [vmem:[%s1644_s23 + $0x88] sm:$0xff]  ;;  %1130 = vst [vmem:[%s1640_s18 + $0x78] sm:$0xff] %v1129_v52  ;;  %v1135_v1 = vld [vmem:[%s1644_s23 + $0x90] sm:$0xff] }
 0x268   : >> { %1132 = vst [vmem:[%s1640_s18 + $0x80] sm:$0xff] %v1131_v14  ;;  %1134 = vst [vmem:[%s1640_s18 + $0x88] sm:$0xff] %v1133_v0  ;;  %v1137_v25 = vld [vmem:[%s1644_s23 + $0x98] sm:$0xff]  ;;  %v1139_v2 = vld [vmem:[%s1644_s23 + $0xa0] sm:$0xff] }
 0x269   : >> { %1136 = vst [vmem:[%s1640_s18 + $0x90] sm:$0xff] %v1135_v1  ;;  %1138 = vst [vmem:[%s1640_s18 + $0x98] sm:$0xff] %v1137_v25  ;;  %v1141_v39 = vld [vmem:[%s1644_s23 + $0xa8] sm:$0xff]  ;;  %v1143_v5 = vld [vmem:[%s1644_s23 + $0xb0] sm:$0xff] }
 0x26a   : >> { %1140 = vst [vmem:[%s1640_s18 + $0xa0] sm:$0xff] %v1139_v2  ;;  %v1145_v9 = vld [vmem:[%s1644_s23 + $0xb8] sm:$0xff]  ;;  %1142 = vst [vmem:[%s1640_s18 + $0xa8] sm:$0xff] %v1141_v39  ;;  %v1147_v17 = vld [vmem:[%s1644_s23 + $0xc0] sm:$0xff] }
 0x26b   : >> { %1144 = vst [vmem:[%s1640_s18 + $0xb0] sm:$0xff] %v1143_v5  ;;  %1146 = vst [vmem:[%s1640_s18 + $0xb8] sm:$0xff] %v1145_v9  ;;  %v1149_v59 = vld [vmem:[%s1644_s23 + $0xc8] sm:$0xff]  ;;  %v1151_v6 = vld [vmem:[%s1644_s23 + $0xd0] sm:$0xff]  ;;  %1095 = sbr.rel (!%p1092_p12) target bundleno = 607 (0x25f), region = 126 }
 0x26c   : >> { %1148 = vst [vmem:[%s1640_s18 + $0xc0] sm:$0xff] %v1147_v17  ;;  %1150 = vst [vmem:[%s1640_s18 + $0xc8] sm:$0xff] %v1149_v59  ;;  %v1153_v43 = vld [vmem:[%s1644_s23 + $0xd8] sm:$0xff]  ;;  %v1155_v26 = vld [vmem:[%s1644_s23 + $0xe0] sm:$0xff] }
 0x26d   : >> { %1152 = vst [vmem:[%s1640_s18 + $0xd0] sm:$0xff] %v1151_v6  ;;  %v1157_v47 = vld [vmem:[%s1644_s23 + $0xe8] sm:$0xff]  ;;  %1154 = vst [vmem:[%s1640_s18 + $0xd8] sm:$0xff] %v1153_v43  ;;  %v1159_v11 = vld [vmem:[%s1644_s23 + $0xf0] sm:$0xff] }
 0x26e   : >> { %1156 = vst [vmem:[%s1640_s18 + $0xe0] sm:$0xff] %v1155_v26  ;;  %1158 = vst [vmem:[%s1640_s18 + $0xe8] sm:$0xff] %v1157_v47  ;;  %v1161_v7 = vld [vmem:[%s1644_s23 + $0xf8] sm:$0xff]  ;;  %s2367_s23 = smov %s2299_s21 }
 0x26f   : >> { %1160 = vst [vmem:[%s1640_s18 + $0xf0] sm:$0xff] %v1159_v11  ;;  %1162 = vst [vmem:[%s1640_s18 + $0xf8] sm:$0xff] %v1161_v7  ;;  %s2366_s18 = smov %s1169_s25 }
 0x270 PF: > { %s2340_s26 = sand.u32 31, %s2373_s15   ;;  %s1332_s27 = sshll.u32 %s2232_s13, 8 }
 0x271   : > { %s1174_s28 = scalar_lea.vmem %s2153_s7, %s1332_s27 [#allocation2]   ;;  %s1176_s29 = scalar_lea.vmem %s2226_s11, %s1332_s27  }
 0x272   : > { %p1326_p13 = scmp.le.s32.totalorder %s2340_s26, 0 }
 0x273   : > { %s1654_s30 = smov (!%p1326_p13), %s1176_s29   ;;  %s1658_s5 = smov (!%p1326_p13), %s1174_s28  }
 0x274   : > { %1267 = sbr.rel (%p1326_p13) target bundleno = 641 (0x281), region = 131  ;;  %s1662_s6 = smov (!%p1326_p13), 0  }
 0x275   : > { %s1666_s8 = smov (!%p1326_p13), 0  }
 0x279 LB: >> { %v1186_v32 = vld [vmem:[%s1660_s5] sm:$0xff]  ;;  %s1188_s15 = sadd.s32 1, %s1664_s6  ;;  %s1180_s8 = sadd.s32 1, %s1668_s8   ;;  %s1668_s8 = sphi %s1666_s8, %s1180_s8   ;;  %s1664_s6 = sphi %s1662_s6, %s1663_s6   ;;  %s1660_s5 = sphi %s1658_s5, %s1193_s5   ;;  %s1656_s30 = sphi %s1654_s30, %s1194_s30  }
 0x27a   : >> { %1187 = vst [vmem:[%s1656_s30] sm:$0xff] %v1186_v32  ;;  %p1189_p0 = scmp.ge.s32.totalorder %s1188_s15, %s2340_s26  ;;  %p1179_p1 = scmp.ge.s32.totalorder %s1180_s8, %s2340_s26 }
 0x27c   : >> { %s2377_s15 = smov (%p1189_p0, %s1188_s15), 0  ;;  %1182 = sbr.rel (!%p1179_p1) target bundleno = 633 (0x279), region = 137 }
 0x27d   : >> { %s1327_s7 = sshll.u32 %s2377_s15, 3  ;;  %s1663_s6 = smov %s2377_s15  }
 0x27e   : >> { %s1193_s5 = scalar_lea.vmem %s1174_s28, %s1327_s7 [#allocation2]   ;;  %s1194_s30 = scalar_lea.vmem %s1176_s29, %s1327_s7  }
 0x281 PF: > { %p11_p2 = scmp.ge.s32.totalorder %s1710_s19, 5   ;;  %s2369_s15 = smov %s1632_s16 }
 0x282   : > { %s2370_s16 = smov %s1718_s22  ;;  %s2371_s17 = smov %s1710_s19 }
 0x283   :  { %13 = sbr.rel (!%p11_p2) target bundleno = 2 (0x2), region = 148 }

</bundles_post_ra>
